<compile_context>
chip_gen: v6e
topology: v6e:2x2x1
jax: 0.10.0
libtpu: 0.0.40
codegen_flags: <defaults>
</compile_context>

<pallas_src>
import jax
import jax.numpy as jnp
from jax.experimental import pallas as pl
from jax.experimental.pallas import tpu as pltpu

SUBLANE = 8
LANE = 128
MAX_BLOCK_ROWS = 1024  # (1024, 128) f32 = 512 KiB/input/step; fits v5e/v6e/v7x VMEM easily.


def _bce_partial_kernel(x_ref, t_ref, o_ref):
    """Per-block BCE partial sums (independent per grid step)."""
    x = x_ref[...].astype(jnp.float32)
    t = t_ref[...].astype(jnp.float32)

    # BCE with PyTorch's clamp of each log term at -100.
    log_x = jnp.maximum(jnp.log(x), -100.0)
    log_1mx = jnp.maximum(jnp.log1p(-x), -100.0)
    loss = -(t * log_x + (1.0 - t) * log_1mx)

    block_rows = loss.shape[0]
    # Fold sublane-groups together with cheap vreg-wise VPU adds; keep an
    # (8, 128) partial so the output store stays lane-dense and unmasked.
    partial = jnp.sum(loss.reshape(block_rows // SUBLANE, SUBLANE, LANE), axis=0)
    o_ref[...] = partial[None, :, :]


def binary_cross_entropy_loss(inp, tgt, loss_weight=1.0):
    """Pallas equivalent of BinaryCrossEntropyLoss.forward (mean reduction)."""
    assert inp.shape == tgt.shape
    n = int(inp.size)
    assert n > 0

    # Tiling: lane-dense (block_rows, 128) tiles, block_rows a multiple of 8,
    # capped at MAX_BLOCK_ROWS. Small inputs get a single right-sized block.
    rows_needed = -(-n // LANE)
    block_rows = min(MAX_BLOCK_ROWS, -(-rows_needed // SUBLANE) * SUBLANE)
    num_tiles = -(-rows_needed // block_rows)
    rows_padded = num_tiles * block_rows
    pad = rows_padded * LANE - n

    flat_x = inp.reshape(-1)
    flat_t = tgt.reshape(-1)
    if pad:
        # x=1, t=1 => loss is exactly 0 under the -100 clamp, so padded
        # elements contribute nothing (no runtime mask needed).
        flat_x = jnp.pad(flat_x, (0, pad), constant_values=1.0)
        flat_t = jnp.pad(flat_t, (0, pad), constant_values=1.0)

    x2 = flat_x.reshape(rows_padded, LANE)
    t2 = flat_t.reshape(rows_padded, LANE)

    partials = pl.pallas_call(
        _bce_partial_kernel,
        out_shape=jax.ShapeDtypeStruct((num_tiles, SUBLANE, LANE), jnp.float32),
        grid_spec=pltpu.PrefetchScalarGridSpec(
            num_scalar_prefetch=0,
            grid=(num_tiles,),
            in_specs=[
                pl.BlockSpec((block_rows, LANE), lambda i: (i, 0)),
                pl.BlockSpec((block_rows, LANE), lambda i: (i, 0)),
            ],
            out_specs=pl.BlockSpec((1, SUBLANE, LANE), lambda i: (i, 0, 0)),
        ),
        compiler_params=pltpu.CompilerParams(
            dimension_semantics=("parallel",),
        ),
    )(x2, t2)

    # Tiny final reduction + static mean / loss_weight scale.
    return jnp.sum(partials) * (float(loss_weight) / n)


def _reference_bce(inp, tgt, loss_weight=1.0):
    x = inp.astype(jnp.float32)
    t = tgt.astype(jnp.float32)
    log_x = jnp.maximum(jnp.log(x), -100.0)
    log_1mx = jnp.maximum(jnp.log1p(-x), -100.0)
    return loss_weight * jnp.mean(-(t * log_x + (1.0 - t) * log_1mx))


if __name__ == "__main__":
    key = jax.random.PRNGKey(0)
    k1, k2 = jax.random.split(key)

    # NCHW, small shapes: batch=2, channels=4, spatial=16x16
    x = jax.nn.sigmoid(jax.random.normal(k1, (2, 4, 16, 16), dtype=jnp.float32))
    t = jax.random.bernoulli(k2, p=0.5, shape=(2, 4, 16, 16)).astype(jnp.float32)

    loss_weight = 1.0
    loss = binary_cross_entropy_loss(x, t, loss_weight=loss_weight)
    loss = jax.block_until_ready(loss)

    ref = _reference_bce(x, t, loss_weight=loss_weight)
    assert jnp.allclose(loss, ref, rtol=1e-5, atol=1e-5), (loss, ref)

    print("KERNEL_OK")
</pallas_src>

<mosaic_0001>
module attributes {stable_mosaic.version = 11 : i64} {
  func.func @_bce_partial_kernel(%arg0: i32, %arg1: memref<16x128xf32, #tpu.memory_space<vmem>>, %arg2: memref<16x128xf32, #tpu.memory_space<vmem>>, %arg3: memref<1x8x128xf32, #tpu.memory_space<vmem>>) attributes {dimension_semantics = [#tpu.dimension_semantics<parallel>], iteration_bounds = array<i64: 1>, scalar_prefetch = 0 : i64, scratch_operands = 0 : i64, tpu.core_type = #tpu.core_type<tc>, window_params = [{transform_indices = @transform_0, window_bounds = array<i64: 16, 128>}, {transform_indices = @transform_1, window_bounds = array<i64: 16, 128>}, {transform_indices = @transform_2, window_bounds = array<i64: 1, 8, 128>}]} {
    %c0 = arith.constant 0 : index
    %c0_0 = arith.constant 0 : index
    %0 = vector.load %arg1[%c0, %c0_0] : memref<16x128xf32, #tpu.memory_space<vmem>>, vector<16x128xf32>
    %c0_1 = arith.constant 0 : index
    %c0_2 = arith.constant 0 : index
    %1 = vector.load %arg2[%c0_1, %c0_2] : memref<16x128xf32, #tpu.memory_space<vmem>>, vector<16x128xf32>
    %2 = math.log %0 : vector<16x128xf32>
    %cst = arith.constant -1.000000e+02 : f32
    %3 = vector.broadcast %cst : f32 to vector<16x128xf32>
    %4 = arith.maximumf %2, %3 : vector<16x128xf32>
    %cst_3 = arith.constant 0.000000e+00 : f32
    %5 = vector.broadcast %cst_3 : f32 to vector<16x128xf32>
    %6 = arith.subf %5, %0 : vector<16x128xf32>
    %7 = math.log1p %6 : vector<16x128xf32>
    %cst_4 = arith.constant -1.000000e+02 : f32
    %8 = vector.broadcast %cst_4 : f32 to vector<16x128xf32>
    %9 = arith.maximumf %7, %8 : vector<16x128xf32>
    %10 = arith.mulf %1, %4 : vector<16x128xf32>
    %cst_5 = arith.constant 1.000000e+00 : f32
    %11 = vector.broadcast %cst_5 : f32 to vector<16x128xf32>
    %12 = arith.subf %11, %1 : vector<16x128xf32>
    %13 = arith.mulf %12, %9 : vector<16x128xf32>
    %14 = arith.addf %10, %13 : vector<16x128xf32>
    %cst_6 = arith.constant 0.000000e+00 : f32
    %15 = vector.broadcast %cst_6 : f32 to vector<16x128xf32>
    %16 = arith.subf %15, %14 : vector<16x128xf32>
    %17 = vector.shape_cast %16 : vector<16x128xf32> to vector<2x8x128xf32>
    %cst_7 = arith.constant dense<0.000000e+00> : vector<8x128xf32>
    %18 = vector.multi_reduction <add>, %17, %cst_7 [0] : vector<2x8x128xf32> to vector<8x128xf32>
    %19 = vector.shape_cast %18 : vector<8x128xf32> to vector<1x8x128xf32>
    %c0_8 = arith.constant 0 : index
    %c0_9 = arith.constant 0 : index
    %c0_10 = arith.constant 0 : index
    %20 = vector.load %arg3[%c0_8, %c0_9, %c0_10] : memref<1x8x128xf32, #tpu.memory_space<vmem>>, vector<1x8x128xf32>
    tpu.vector_store %arg3[%c0_8, %c0_9, %c0_10], %19 {strides = array<i32>} : memref<1x8x128xf32, #tpu.memory_space<vmem>>, vector<1x8x128xf32>,
    return
  }
  func.func @transform_0(%arg0: i32) -> (i32, i32) {
    %c0_i32 = arith.constant 0 : i32
    %c0_i32_0 = arith.constant 0 : i32
    return %arg0, %c0_i32 : i32, i32
  }
  func.func @transform_1(%arg0: i32) -> (i32, i32) {
    %c0_i32 = arith.constant 0 : i32
    %c0_i32_0 = arith.constant 0 : i32
    return %arg0, %c0_i32 : i32, i32
  }
  func.func @transform_2(%arg0: i32) -> (i32, i32, i32) {
    %c0_i32 = arith.constant 0 : i32
    %c0_i32_0 = arith.constant 0 : i32
    %c0_i32_1 = arith.constant 0 : i32
    return %arg0, %c0_i32, %c0_i32_0 : i32, i32, i32
  }
}

</mosaic_0001>

<bundles_post_ra>
// kernel: tpu_custom_call.1
= control target key start
LH: loop header
LB: loop body
LE: loop exit
PB: predicated region body
PF: predicated region fallthrough
CT: control target
= control target key end

     0   :  { %7 = vsyncpa [#allocation3], 0  ;;  %s208_s0 = inlined_call_operand.hbm [shape: f32[16,128], index: 0, kind: input, shape index: {}]   ;;  %s209_s1 = inlined_call_operand.hbm [shape: f32[16,128], index: 1, kind: input, shape index: {}]   ;;  %s210_s2 = inlined_call_operand.hbm [shape: f32[1,8,128], index: 2, kind: output, shape index: {}]  }
   0x1   :  { %8 = vsyncpa [#allocation6], 0 }
   0x2   :  { %9 = vsyncpa [#allocation4], 0  ;;  %s179_s9 = smov [#allocation2]  }
   0x3   :  { %s15_s10 = sshll.u32 %s179_s9, 4  ;;  %s16_s10 = int_to_ptr.vmem [resolvable:$true] %s15_s10 }
   0x4   :  { %s121_s11 = scalar_lea.vmem %s16_s10, 256  ;;  %p126_p1 = scmp.lt.s32.totalorder %s16_s10, %s16_s10 }
   0x5   :  { %p122_p0 = scmp.ne.s32.totalorder %s16_s10, %s121_s11  ;;  %p127_p2 = scmp.lt.s32.totalorder %s121_s11, %s121_s11 }
   0x7   :  { %p128_p3 = por %p127_p2, %p126_p1 }
   0x9   :  { %p129_p4 = pnand %p128_p3, %p122_p0 }
   0xb   :  { %132 = shalt.err (!%p129_p4)
}
   0xc   :  { %s180_s12 = smov 128   ;;  %s181_s13 = smov 8  }
   0xd   :  { %21 = dma.hbm_to_vmem [thread:$0]  %s208_s0, 256, %s16_s10, [#allocation3], %s180_s12, %s180_s12, %s181_s13  }
   0xe   :  { %s182_s16 = smov [#allocation5]  }
   0xf   :  { %s27_s17 = sshll.u32 %s182_s16, 4  ;;  %s28_s17 = int_to_ptr.vmem [resolvable:$true] %s27_s17 }
  0x10   :  { %s141_s18 = scalar_lea.vmem %s28_s17, 256  ;;  %p146_p6 = scmp.lt.s32.totalorder %s28_s17, %s28_s17 }
  0x11   :  { %p142_p5 = scmp.ne.s32.totalorder %s28_s17, %s141_s18  ;;  %p147_p7 = scmp.lt.s32.totalorder %s141_s18, %s141_s18 }
  0x13   :  { %p148_p8 = por %p147_p7, %p146_p6 }
  0x15   :  { %p149_p9 = pnand %p148_p8, %p142_p5 }
  0x17   :  { %152 = shalt.err (!%p149_p9)
}
  0x18   :  { %33 = dma.hbm_to_vmem [thread:$0]  %s209_s1, 256, %s28_s17, [#allocation6], %s180_s12, %s180_s12, %s181_s13  }
  0x19   :  { %173 = dma.done.wait [#allocation3], 256  }
  0x1a   :  { %174 = vsyncadd [#allocation3], 4294967040 }
  0x1b   :  { %175 = dma.done.wait [#allocation6], 256  }
  0x1c   :  { %176 = vsyncadd [#allocation6], 4294967040  ;;  %v40_v0 = vld [vmem:[#allocation2] sm:$0xff]  ;;  %v41_v1 = vld [vmem:[#allocation2 + $0x8] sm:$0xff]  ;;  %s183_s0 = smov [#allocation7]  }
  0x1d   :  { %105 = vlog2.f32 %v40_v0  ;;  %v50_v2 = vsub.f32 0.0, %v40_v0  ;;  %v51_v3 = vsub.f32 0.0, %v41_v1  ;;  %v42_v16 = vld [vmem:[#allocation5] sm:$0xff]  ;;  %v43_v19 = vld [vmem:[#allocation5 + $0x8] sm:$0xff]  ;;  %s90_s1 = sshll.u32 %s183_s0, 4  ;;  %s91_s1 = int_to_ptr.vmem [resolvable:$true] %s90_s1 }
  0x1e   :  { %107 = vlog2.f32 %v41_v1  ;;  %v74_v26 = vsub.f32 1.0, %v42_v16  ;;  %v75_v28 = vsub.f32 1.0, %v43_v19  ;;  %s153_s21 = scalar_lea.vmem %s91_s1, 128  ;;  %p158_p11 = scmp.lt.s32.totalorder %s91_s1, %s91_s1 }
  0x1f   :  { %v52_v4 = vadd.f32 1.0, %v50_v2  ;;  %v61_v5 = vadd.f32 1.0, %v51_v3  ;;  %v55_v6 = vmul.f32 -0.5, %v50_v2  ;;  %v64_v7 = vmul.f32 -0.5, %v51_v3  ;;  %p154_p10 = scmp.ne.s32.totalorder %s91_s1, %s153_s21  ;;  %p159_p12 = scmp.lt.s32.totalorder %s153_s21, %s153_s21 }
  0x20   :  { %v58_v10 = vand.u32 2147483647, %v50_v2  ;;  %v67_v14 = vand.u32 2147483647, %v51_v3 }
  0x21   :  { %109 = vlog2.f32 %v52_v4  ;;  %v56_v8 = vadd.f32 1.0, %v55_v6  ;;  %v65_v11 = vadd.f32 1.0, %v64_v7  ;;  %p160_p13 = por %p159_p12, %p158_p11 }
  0x22   :  { %111 = vlog2.f32 %v61_v5  ;;  %vm59_vm0 = vcmp.lt.f32.partialorder %v58_v10, 0.0004427343  ;;  %vm68_vm1 = vcmp.lt.f32.partialorder %v67_v14, 0.0004427343 }
  0x23   :  { %v57_v17 = vmul.f32 %v56_v8, %v50_v2  ;;  %v66_v21 = vmul.f32 %v65_v11, %v51_v3  ;;  %p161_p0 = pnand %p160_p13, %p154_p10 }
  0x2a   :  { %v106_v9 = vpop.eup %105 }
  0x2b   :  { %v108_v12 = vpop.eup %107  ;;  %v45_v13 = vmul.f32 0.6931472, %v106_v9 }
  0x2c   :  { %v47_v15 = vmul.f32 0.6931472, %v108_v12 }
  0x2d   :  { %v48_v20 = vmax.f32 %v45_v13, -100.0 }
  0x2e   :  { %v110_v18 = vpop.eup %109  ;;  %v49_v23 = vmax.f32 %v47_v15, -100.0 }
  0x2f   :  { %v112_v22 = vpop.eup %111  ;;  %v54_v24 = vmul.f32 0.6931472, %v110_v18  ;;  %v72_v31 = vmul.f32 %v48_v20, %v42_v16 }
  0x30   :  { %v63_v25 = vmul.f32 0.6931472, %v112_v22  ;;  %v73_v33 = vmul.f32 %v49_v23, %v43_v19 }
  0x31   :  { %v60_v27 = vsel %vm59_vm0, %v57_v17, %v54_v24 }
  0x32   :  { %v69_v29 = vsel %vm68_vm1, %v66_v21, %v63_v25  ;;  %v70_v30 = vmax.f32 %v60_v27, -100.0 }
  0x33   :  { %v71_v32 = vmax.f32 %v69_v29, -100.0 }
  0x34   :  { %v76_v34 = vmul.f32 %v74_v26, %v70_v30 }
  0x35   :  { %v77_v35 = vmul.f32 %v75_v28, %v71_v32 }
  0x36   :  { %v78_v36 = vadd.f32 %v76_v34, %v72_v31 }
  0x37   :  { %v79_v37 = vadd.f32 %v77_v35, %v73_v33 }
  0x38   :  { %v80_v38 = vsub.f32 0.0, %v78_v36 }
  0x39   :  { %v81_v39 = vsub.f32 0.0, %v79_v37 }
  0x3b   :  { %v82_v40 = vadd.f32 %v81_v39, %v80_v38 }
  0x3d   :  { %83 = vst [vmem:[#allocation7] sm:$0xff] %v82_v40 }
  0x3e   :  { %164 = shalt.err (!%p161_p0)
}
  0x3f   :  { %93 = dma.vmem_to_hbm [thread:$0]  %s91_s1, 128, %s210_s2, [#allocation4]  }
  0x40   :  { %177 = dma.done.wait [#allocation4], 128  }
  0x41   :  { %178 = vsyncadd [#allocation4], 4294967168 }
  0x42   :  { %97 = vsyncpa [#allocation3], 1 }
  0x43   :  { %98 = vsyncpa [#allocation6], 1 }
  0x44   :  { %99 = vsyncpa [#allocation4], 1 }

</bundles_post_ra>
